<compile_context>
chip_gen: v7x
topology: tpu7x:2x2x1
jax: 0.10.0
libtpu: 0.0.40
codegen_flags: <defaults>
</compile_context>

<pallas_src>
import jax
import jax.numpy as jnp
from jax.experimental import pallas as pl
from jax.experimental.pallas import tpu as pltpu


def _round_up(x, m):
    return (x + m - 1) // m * m


def _outconv_kernel(x_ref, w_ref, b_ref, o_ref):
    # x_ref: (Bn, Cin, T), w_ref: (Cout, Cin), b_ref: (Cout, 1), o_ref: (Bn, Cout, T)
    w = w_ref[...]
    b = b_ref[...].astype(jnp.float32)
    for i in range(x_ref.shape[0]):  # static small Bn -> unrolled
        acc = jnp.dot(w, x_ref[i], preferred_element_type=jnp.float32) + b
        o_ref[i] = acc.astype(o_ref.dtype)


def _choose_tiling(n, cin, cout, hw, itemsize):
    """Pick (Bn, spatial TILE, vmem_limit_bytes) by bytes, not lanes."""
    try:
        vmem_cap = int(pltpu.get_tpu_info().vmem_capacity_bytes)
        if vmem_cap < (64 << 20):  # unexpected generation -> be conservative
            vmem_cap = None
    except Exception:
        vmem_cap = None

    if vmem_cap is None:
        # Unknown chip: fit the smallest default scoped VMEM (v5e: 16 MiB),
        # don't touch vmem_limit_bytes.
        target = 4 << 20
        budget = 12 << 20
    else:
        # ~8 MiB/step on 128-MiB chips (v5e/v6e), ~4 MiB/step on 64-MiB v7x.
        target = max(2 << 20, min(8 << 20, vmem_cap // 16))
        # Pipeline-buffer budget (double-buffered in+out blocks).
        budget = max(8 << 20, min(vmem_cap // 3, 40 << 20))

    hw_ceil = _round_up(hw, 128)

    # Lane-dense spatial tile from the byte target (multiple of 128 lanes).
    tile = target // max(1, cin * itemsize)
    tile = max(512, tile // 512 * 512)
    tile = min(tile, hw_ceil)
    tile = max(tile, min(2048, hw_ceil))

    # Block several batch elements per step when the spatial axis alone can't
    # reach the byte target (small HW and/or tiny Cin). Bn divides N exactly.
    bn_want = int(min(16, max(1, target // max(1, cin * tile * itemsize))))
    bn = max(d for d in range(1, n + 1) if n % d == 0 and d <= bn_want)

    cin_pad = _round_up(cin, 8)
    cout_pad = _round_up(cout, 8)

    def footprint(bn_, t_):  # double-buffered input + output blocks
        return 2 * bn_ * (cin_pad + cout_pad) * t_ * itemsize

    while footprint(bn, tile) > budget:
        if bn > 1:
            bn = max(d for d in range(1, bn) if n % d == 0)
        elif tile > 128:
            tile = max(128, _round_up(tile // 2, 128))
        else:
            break

    vmem_limit = None
    if vmem_cap is not None:
        need = footprint(bn, tile) * 3 // 2 + (8 << 20)  # generous headroom
        vmem_limit = int(min(vmem_cap - (8 << 20), max(32 << 20, need)))
    return bn, tile, vmem_limit


@jax.jit
def outconv_forward(x_nchw, weight, bias):
    """1x1 conv forward, matching nn.Conv2d(in_channels, out_channels, kernel_size=1).

    x_nchw : (N, Cin, H, W)
    weight : (Cout, Cin, 1, 1)
    bias   : (Cout,)
    returns (N, Cout, H, W)
    """
    n, cin, h, w = x_nchw.shape
    cout = weight.shape[0]
    hw = h * w

    # Pure reshapes only — no transpose or pad passes over HBM.
    x3 = x_nchw.reshape(n, cin, hw)     # (N, Cin, HW)
    w_mat = weight.reshape(cout, cin)   # (Cout, Cin)
    b_mat = bias.reshape(cout, 1)       # (Cout, 1)

    bn, tile, vmem_limit = _choose_tiling(n, cin, cout, hw, x_nchw.dtype.itemsize)
    grid = (n // bn, pl.cdiv(hw, tile))  # ragged last spatial block handled by Pallas

    cp_kwargs = dict(dimension_semantics=("parallel", "parallel"))
    if vmem_limit is not None:
        cp_kwargs["vmem_limit_bytes"] = vmem_limit

    out = pl.pallas_call(
        _outconv_kernel,
        out_shape=jax.ShapeDtypeStruct((n, cout, hw), x_nchw.dtype),
        grid_spec=pltpu.PrefetchScalarGridSpec(
            num_scalar_prefetch=0,
            grid=grid,
            in_specs=[
                # x block: (Bn, Cin, TILE) — Cin is the full extent, TILE lane-dense.
                pl.BlockSpec((bn, cin, tile), lambda b, j: (b, 0, j)),
                # Weight / bias: constant index -> VMEM-resident across the grid.
                pl.BlockSpec((cout, cin), lambda b, j: (0, 0)),
                pl.BlockSpec((cout, 1), lambda b, j: (0, 0)),
            ],
            # Output block (Bn, Cout, TILE): unmasked lane-dense stores except on
            # the final ragged spatial block (masked write there).
            out_specs=pl.BlockSpec((bn, cout, tile), lambda b, j: (b, 0, j)),
        ),
        compiler_params=pltpu.CompilerParams(**cp_kwargs),
    )(x3, w_mat, b_mat)

    return out.reshape(n, cout, h, w)


def _reference(x_nchw, weight, bias):
    # Pure-JAX reference of nn.Conv2d(kernel_size=1).
    w_mat = weight.reshape(weight.shape[0], weight.shape[1])  # (Cout, Cin)
    return jnp.einsum("nchw,oc->nohw", x_nchw, w_mat) + bias[None, :, None, None]


if __name__ == "__main__":
    key = jax.random.PRNGKey(0)
    kx, kw, kb = jax.random.split(key, 3)

    N, Cin, H, W = 2, 4, 16, 16
    Cout = 3

    x = jax.random.normal(kx, (N, Cin, H, W), dtype=jnp.float32)

    # Deterministic Conv2d-style uniform init (bound = 1/sqrt(fan_in)).
    bound = 1.0 / (Cin ** 0.5)
    weight = jax.random.uniform(kw, (Cout, Cin, 1, 1), jnp.float32, -bound, bound)
    bias = jax.random.uniform(kb, (Cout,), jnp.float32, -bound, bound)

    out = jax.block_until_ready(outconv_forward(x, weight, bias))

    ref = _reference(x, weight, bias)
    assert out.shape == (N, Cout, H, W)
    assert jnp.allclose(out, ref, atol=1e-5, rtol=1e-5)

    print("KERNEL_OK")
</pallas_src>

<mosaic_0001>
module attributes {stable_mosaic.version = 11 : i64} {
  func.func @_outconv_kernel(%arg0: i32, %arg1: i32, %arg2: memref<2x4x256xf32, #tpu.memory_space<vmem>>, %arg3: memref<3x4xf32, #tpu.memory_space<vmem>>, %arg4: memref<3x1xf32, #tpu.memory_space<vmem>>, %arg5: memref<2x3x256xf32, #tpu.memory_space<vmem>>) attributes {dimension_semantics = [#tpu.dimension_semantics<parallel>, #tpu.dimension_semantics<parallel>], iteration_bounds = array<i64: 1, 1>, scalar_prefetch = 0 : i64, scratch_operands = 0 : i64, tpu.core_type = #tpu.core_type<tc>, window_params = [{transform_indices = @transform_0, window_bounds = array<i64: 2, 4, 256>}, {pipeline_mode = #tpu.pipeline_mode<synchronous>, transform_indices = @transform_1, window_bounds = array<i64: 3, 4>}, {pipeline_mode = #tpu.pipeline_mode<synchronous>, transform_indices = @transform_2, window_bounds = array<i64: 3, 1>}, {transform_indices = @transform_3, window_bounds = array<i64: 2, 3, 256>}]} {
    %c0 = arith.constant 0 : index
    %c0_0 = arith.constant 0 : index
    %0 = vector.load %arg3[%c0, %c0_0] : memref<3x4xf32, #tpu.memory_space<vmem>>, vector<3x4xf32>
    %c0_1 = arith.constant 0 : index
    %c0_2 = arith.constant 0 : index
    %1 = vector.load %arg4[%c0_1, %c0_2] : memref<3x1xf32, #tpu.memory_space<vmem>>, vector<3x1xf32>
    %c0_3 = arith.constant 0 : index
    %c0_4 = arith.constant 0 : index
    %c0_5 = arith.constant 0 : index
    %2 = vector.load %arg2[%c0_3, %c0_4, %c0_5] : memref<2x4x256xf32, #tpu.memory_space<vmem>>, vector<1x4x256xf32>
    %3 = vector.shape_cast %2 : vector<1x4x256xf32> to vector<4x256xf32>
    %cst = arith.constant dense<0.000000e+00> : vector<3x256xf32>
    %4 = tpu.matmul %0, %3, %cst {dimension_numbers = #tpu.dot_dimension_numbers<[1], [0], [0], [1], [0, 0, 1, 1], [], []>} : vector<3x4xf32>, vector<4x256xf32>, vector<3x256xf32> -> vector<3x256xf32>
    %5 = vector.broadcast %1 : vector<3x1xf32> to vector<3x256xf32>
    %6 = arith.addf %4, %5 : vector<3x256xf32>
    %c0_6 = arith.constant 0 : index
    %c0_7 = arith.constant 0 : index
    %c0_8 = arith.constant 0 : index
    %7 = vector.load %arg5[%c0_6, %c0_7, %c0_8] : memref<2x3x256xf32, #tpu.memory_space<vmem>>, vector<1x3x256xf32>
    %8 = vector.shape_cast %7 : vector<1x3x256xf32> to vector<3x256xf32>
    %9 = vector.shape_cast %6 : vector<3x256xf32> to vector<1x3x256xf32>
    tpu.vector_store %arg5[%c0_6, %c0_7, %c0_8], %9 {strides = array<i32>} : memref<2x3x256xf32, #tpu.memory_space<vmem>>, vector<1x3x256xf32>,
    %c1 = arith.constant 1 : index
    %c0_9 = arith.constant 0 : index
    %c0_10 = arith.constant 0 : index
    %10 = vector.load %arg2[%c1, %c0_9, %c0_10] : memref<2x4x256xf32, #tpu.memory_space<vmem>>, vector<1x4x256xf32>
    %11 = vector.shape_cast %10 : vector<1x4x256xf32> to vector<4x256xf32>
    %cst_11 = arith.constant dense<0.000000e+00> : vector<3x256xf32>
    %12 = tpu.matmul %0, %11, %cst_11 {dimension_numbers = #tpu.dot_dimension_numbers<[1], [0], [0], [1], [0, 0, 1, 1], [], []>} : vector<3x4xf32>, vector<4x256xf32>, vector<3x256xf32> -> vector<3x256xf32>
    %13 = vector.broadcast %1 : vector<3x1xf32> to vector<3x256xf32>
    %14 = arith.addf %12, %13 : vector<3x256xf32>
    %c1_12 = arith.constant 1 : index
    %c0_13 = arith.constant 0 : index
    %c0_14 = arith.constant 0 : index
    %15 = vector.load %arg5[%c1_12, %c0_13, %c0_14] : memref<2x3x256xf32, #tpu.memory_space<vmem>>, vector<1x3x256xf32>
    %16 = vector.shape_cast %15 : vector<1x3x256xf32> to vector<3x256xf32>
    %17 = vector.shape_cast %14 : vector<3x256xf32> to vector<1x3x256xf32>
    tpu.vector_store %arg5[%c1_12, %c0_13, %c0_14], %17 {strides = array<i32>} : memref<2x3x256xf32, #tpu.memory_space<vmem>>, vector<1x3x256xf32>,
    return
  }
  func.func @transform_0(%arg0: i32, %arg1: i32) -> (i32, i32, i32) {
    %c0_i32 = arith.constant 0 : i32
    %c0_i32_0 = arith.constant 0 : i32
    return %arg0, %c0_i32, %arg1 : i32, i32, i32
  }
  func.func @transform_1(%arg0: i32, %arg1: i32) -> (i32, i32) {
    %c0_i32 = arith.constant 0 : i32
    %c0_i32_0 = arith.constant 0 : i32
    %c0_i32_1 = arith.constant 0 : i32
    return %c0_i32, %c0_i32_0 : i32, i32
  }
  func.func @transform_2(%arg0: i32, %arg1: i32) -> (i32, i32) {
    %c0_i32 = arith.constant 0 : i32
    %c0_i32_0 = arith.constant 0 : i32
    %c0_i32_1 = arith.constant 0 : i32
    return %c0_i32, %c0_i32_0 : i32, i32
  }
  func.func @transform_3(%arg0: i32, %arg1: i32) -> (i32, i32, i32) {
    %c0_i32 = arith.constant 0 : i32
    %c0_i32_0 = arith.constant 0 : i32
    return %arg0, %c0_i32, %arg1 : i32, i32, i32
  }
}

</mosaic_0001>

<bundles_post_ra>
// kernel: outconv_forward.1
= control target key start
LH: loop header
LB: loop body
LE: loop exit
PB: predicated region body
PF: predicated region fallthrough
CT: control target
= control target key end

     0   :  { %vm28_vm0 = vcmask 1043456   ;;  %v211_v2 = vmov 0.0   ;;  %v212_v5 = vmov 0   ;;  %vm24_vm1 = vcmask 31744   ;;  %s255_s0 = inlined_call_operand.vmem [shape: f32[2,4,256], index: 0, kind: input, shape index: {}]   ;;  %s256_s1 = inlined_call_operand.vmem [shape: f32[3,4], index: 1, kind: input, shape index: {}]   ;;  %s257_s2 = inlined_call_operand.vmem [shape: f32[3,1], index: 2, kind: input, shape index: {}]   ;;  %s258_s3 = inlined_call_operand.vmem [shape: f32[2,3,256], index: 3, kind: output, shape index: {}]  }
   0x1   :  { %v16_v0 = vld [vmem:[%s255_s0] sm:$0xff]  ;;  %v201_v1 = vld [vmem:[%s255_s0 + $0x8] sm:$0xff]  ;;  %97 = vmatprep.mubr.f32.mxu0 %v211_v2  ;;  %181 = vmatprep.mubr.f32.mxu1 %v211_v2 }
   0x2   :  { %v23_v3 = vcombine.high %v16_v0, %v16_v0  ;;  %v112_v4 = vcombine.high %v201_v1, %v201_v1  ;;  %208 = vset.pattern.permute.xlu0 %v212_v5  ;;  %v15_v6 = vld [vmem:[%s257_s2] sm:$0x7] }
   0x3   :  { %v14_v7 = vld [vmem:[%s256_s1] sm:$0x7]  ;;  %19 = vperm.xlu0 %208, %v15_v6  }
   0x4   :  { %198 = vmatprep.subr.msk.mxu0 %vm28_vm0, %v23_v3  ;;  %202 = vmatprep.subr.msk.mxu1 %vm28_vm0, %v112_v4 }
   0x5   :  { %199 = vmatpush1.msk.msra.mxu0 %vm28_vm0, %v16_v0  ;;  %203 = vmatpush1.msk.msra.mxu1 %vm28_vm0, %v201_v1 }
   0x6   :  { %200 = vmatmul.mubr.msk.f32.vlgmr.msra.gmra.mrb[0].mxu0 %vm24_vm1, %v14_v7  ;;  %204 = vmatmul.mubr.msk.f32.vlgmr.msra.gmra.mrb[0].mxu1 %vm24_vm1, %v14_v7 }
  0x82   :  { %v20_v8 = vpop.permute.xlu0 %19 }
  0xd9   :  { %v99_v9 = vpop.f32.mrb[0].mxu0  ;;  %v183_v10 = vpop.f32.mrb[0].mxu1 }
  0xda   :  { %v100_v11 = vadd.f32 %v99_v9, %v20_v8  ;;  %v184_v12 = vadd.f32 %v183_v10, %v20_v8  ;;  %v101_v13 = vpop.f32.mrb[1].mxu0  ;;  %v185_v14 = vpop.f32.mrb[1].mxu1 }
  0xdb   :  { %v102_v15 = vadd.f32 %v101_v13, %v20_v8  ;;  %v186_v16 = vadd.f32 %v185_v14, %v20_v8 }
  0xdd   :  { %v106_v17 = vcombine.low %v100_v11, %v102_v15  ;;  %v190_v18 = vcombine.low %v184_v12, %v186_v16 }
  0xdf   :  { %108 = vst [vmem:[%s258_s3] sm:$0x77] %v106_v17  ;;  %205 = vst [vmem:[%s258_s3 + $0x8] sm:$0x77] %v190_v18 }

</bundles_post_ra>
